<compile_context>
chip_gen: v7x
topology: tpu7x:2x2x1
jax: 0.10.0
libtpu: 0.0.40
codegen_flags: <defaults>
</compile_context>

<pallas_src>
import functools
import math

import jax
import jax.numpy as jnp
from jax.experimental import pallas as pl
from jax.experimental.pallas import tpu as pltpu


def _sigmoid(x):
    # Single EUP tanh (cheaper than 1/(1+exp(-x)) = exp + divide), matches
    # torch.sigmoid numerically; sigmoid(-inf) -> 0, sigmoid(+inf) -> 1.
    return 0.5 * jnp.tanh(0.5 * x) + 0.5


def _sigsoftmax_kernel(x_ref, o_ref, *, epsilon: float):
    x = x_ref[...].astype(jnp.float32)                        # [TM, D]
    x_max = jnp.max(x, axis=-1, keepdims=True)
    # numerator = exp(x - rowmax(x)) * (sigmoid(x) + eps)  (no log, no 2nd exp)
    num = jnp.exp(x - x_max) * (_sigmoid(x) + epsilon)
    denom = jnp.sum(num, axis=-1, keepdims=True)              # [TM, 1]
    inv = pl.reciprocal(denom, approx=False)                  # tiny (TM elems)
    o_ref[...] = (num * inv).astype(o_ref.dtype)


def _sigsoftmax_masked_kernel(x_ref, m_ref, o_ref, *, epsilon: float):
    x = x_ref[...].astype(jnp.float32)                        # [TM, D]
    keep = m_ref[...] != 0                                    # int8 mask stream
    # masked_fill(~mask, -inf): exp(-inf - max) = 0 and sigmoid(-inf) = 0, so
    # masked lanes contribute exactly 0 to numerator and denominator.
    x = jnp.where(keep, x, -jnp.inf)
    x_max = jnp.max(x, axis=-1, keepdims=True)
    num = jnp.exp(x - x_max) * (_sigmoid(x) + epsilon)
    denom = jnp.sum(num, axis=-1, keepdims=True)
    inv = pl.reciprocal(denom, approx=False)
    o_ref[...] = (num * inv).astype(o_ref.dtype)
    # NOTE: fully-masked rows produce NaN (denom == 0), matching PyTorch's
    # behavior for an all-masked softmax.


def _choose_block_rows(rows: int, d: int, stream_bytes_per_row: int) -> int:
    """Row tile sized by bytes: double-buffered streams + ~4 f32 temps per tile,
    kept under v5e's 16 MiB default scoped VMEM (safe on v6e/v7x too)."""
    budget = 14 * 1024 * 1024
    per_row = 2 * stream_bytes_per_row + 4 * 4 * d   # 2x double-buffer + temps
    tm = budget // max(1, per_row)
    # Guarantee >=2 (ideally >=4) grid steps so the "parallel" axis can be
    # sharded across v7x's 2 TensorCores and the pipeline has overlap.
    tm = min(tm, max(32, pl.cdiv(rows, 4)))
    if tm >= 32:
        tm = (tm // 32) * 32            # bf16 (16,128) / int8 (32,128) packing
    else:
        tm = max(8, (tm // 8) * 8)
    return max(1, min(tm, rows))


def sigsoftmax(x, mask=None, *, dim: int = -1, epsilon: float = 1e-12,
               block_rows=None):
    """JAX/Pallas equivalent of SigSoftmax.forward.

    x:    float array, sig-softmax taken over `dim`.
    mask: optional boolean array broadcastable to x; False entries are filled
          with -inf (probability 0).
    """
    orig_dtype = x.dtype
    ndim = x.ndim
    axis = dim % ndim

    use_mask = mask is not None
    if use_mask:
        # TODO(synk): low-rank masks (e.g. [B,1,1,D]) could get their own
        # BlockSpec instead of being materialized at full R x D (int8).
        mask = jnp.broadcast_to(mask, x.shape)

    if axis != ndim - 1:
        x = jnp.moveaxis(x, axis, -1)
        if use_mask:
            mask = jnp.moveaxis(mask, axis, -1)

    d = x.shape[-1]
    rows = math.prod(x.shape[:-1]) if x.ndim > 1 else 1
    x2 = x.reshape(rows, d)
    if use_mask:
        m2 = mask.reshape(rows, d).astype(jnp.int8)   # 1 B/elem mask stream

    xb = jnp.dtype(orig_dtype).itemsize
    stream_bytes_per_row = d * (2 * xb + (1 if use_mask else 0))  # x, out[, m]
    tm = (block_rows if block_rows is not None
          else _choose_block_rows(rows, d, stream_bytes_per_row))
    tm = max(1, min(int(tm), rows))

    # No padding / slicing: ragged last block is handled by Pallas (padded
    # reads, masked stores); rows are independent so edge garbage is inert.
    grid = (pl.cdiv(rows, tm),)
    spec = pl.BlockSpec((tm, d), lambda i: (i, 0))
    compiler_params = pltpu.CompilerParams(
        dimension_semantics=("parallel",),
        vmem_limit_bytes=32 * 1024 * 1024,   # within scoped VMEM on v5e/v6e/v7x
    )

    if use_mask:
        out2 = pl.pallas_call(
            functools.partial(_sigsoftmax_masked_kernel, epsilon=epsilon),
            out_shape=jax.ShapeDtypeStruct((rows, d), orig_dtype),
            grid=grid,
            in_specs=[spec, spec],
            out_specs=spec,
            compiler_params=compiler_params,
        )(x2, m2)
    else:
        out2 = pl.pallas_call(
            functools.partial(_sigsoftmax_kernel, epsilon=epsilon),
            out_shape=jax.ShapeDtypeStruct((rows, d), orig_dtype),
            grid=grid,
            in_specs=[spec],
            out_specs=spec,
            compiler_params=compiler_params,
        )(x2)

    out = out2.reshape(x.shape)
    if axis != ndim - 1:
        out = jnp.moveaxis(out, -1, axis)
    return out


def _sigsoftmax_ref(x, mask=None, dim: int = -1, epsilon: float = 1e-12):
    """Pure-JAX reference mirroring the PyTorch code exactly."""
    x = x.astype(jnp.float32)
    if mask is not None:
        x = jnp.where(mask, x, -jnp.inf)
    z = x + jnp.log(jax.nn.sigmoid(x) + epsilon)
    return jax.nn.softmax(z, axis=dim)


if __name__ == "__main__":
    key = jax.random.PRNGKey(0)
    kx, km, ky = jax.random.split(key, 3)

    # Case 1: no mask, attention-score-like shape, auto row tile (grid of 2).
    B, H, S, D = 2, 4, 8, 128
    x = jax.random.normal(kx, (B, H, S, D), dtype=jnp.float32)
    out1 = jax.block_until_ready(sigsoftmax(x))
    ref1 = _sigsoftmax_ref(x)
    assert jnp.allclose(out1, ref1, atol=1e-5, rtol=1e-5), \
        float(jnp.max(jnp.abs(out1 - ref1)))

    # Case 2: boolean mask + ragged last grid block (rows=42, TM=32).
    B2, H2, S2 = 2, 3, 7
    x2 = jax.random.normal(ky, (B2, H2, S2, D), dtype=jnp.float32) * 3.0
    mask = jax.random.bernoulli(km, 0.8, (B2, H2, S2, D))
    mask = mask.at[..., 0].set(True)          # keep >=1 entry per row
    out2 = jax.block_until_ready(sigsoftmax(x2, mask))
    ref2 = _sigsoftmax_ref(x2, mask)
    assert jnp.allclose(out2, ref2, atol=1e-5, rtol=1e-5), \
        float(jnp.max(jnp.abs(out2 - ref2)))

    print("KERNEL_OK")
</pallas_src>

<mosaic_0001>
module attributes {stable_mosaic.version = 11 : i64} {
  func.func @_sigsoftmax_kernel(%arg0: i32, %arg1: memref<32x128xf32, #tpu.memory_space<vmem>>, %arg2: memref<32x128xf32, #tpu.memory_space<vmem>>) attributes {dimension_semantics = [#tpu.dimension_semantics<parallel>], iteration_bounds = array<i64: 2>, scalar_prefetch = 0 : i64, scratch_operands = 0 : i64, tpu.core_type = #tpu.core_type<tc>, window_params = [{transform_indices = @transform_0, window_bounds = array<i64: 32, 128>}, {transform_indices = @transform_1, window_bounds = array<i64: 32, 128>}]} {
    %c0 = arith.constant 0 : index
    %c0_0 = arith.constant 0 : index
    %0 = vector.load %arg1[%c0, %c0_0] : memref<32x128xf32, #tpu.memory_space<vmem>>, vector<32x128xf32>
    %cst = arith.constant dense<0xFF800000> : vector<32xf32>
    %1 = vector.multi_reduction <maximumf>, %0, %cst [1] : vector<32x128xf32> to vector<32xf32>
    %2 = vector.shape_cast %1 : vector<32xf32> to vector<32x1xf32>
    %3 = vector.broadcast %2 : vector<32x1xf32> to vector<32x128xf32>
    %4 = arith.subf %0, %3 : vector<32x128xf32>
    %5 = math.exp %4 : vector<32x128xf32>
    %cst_1 = arith.constant 5.000000e-01 : f32
    %6 = vector.broadcast %cst_1 : f32 to vector<32x128xf32>
    %7 = arith.mulf %6, %0 : vector<32x128xf32>
    %8 = math.tanh %7 : vector<32x128xf32>
    %cst_2 = arith.constant 5.000000e-01 : f32
    %9 = vector.broadcast %cst_2 : f32 to vector<32x128xf32>
    %10 = arith.mulf %9, %8 : vector<32x128xf32>
    %cst_3 = arith.constant 5.000000e-01 : f32
    %11 = vector.broadcast %cst_3 : f32 to vector<32x128xf32>
    %12 = arith.addf %10, %11 : vector<32x128xf32>
    %cst_4 = arith.constant 9.99999996E-13 : f32
    %13 = vector.broadcast %cst_4 : f32 to vector<32x128xf32>
    %14 = arith.addf %12, %13 : vector<32x128xf32>
    %15 = arith.mulf %5, %14 : vector<32x128xf32>
    %cst_5 = arith.constant dense<0.000000e+00> : vector<32xf32>
    %16 = vector.multi_reduction <add>, %15, %cst_5 [1] : vector<32x128xf32> to vector<32xf32>
    %17 = vector.shape_cast %16 : vector<32xf32> to vector<32x1xf32>
    %18 = tpu.reciprocal %17 : vector<32x1xf32> -> vector<32x1xf32>
    %19 = vector.broadcast %18 : vector<32x1xf32> to vector<32x128xf32>
    %20 = arith.mulf %15, %19 : vector<32x128xf32>
    %c0_6 = arith.constant 0 : index
    %c0_7 = arith.constant 0 : index
    %21 = vector.load %arg2[%c0_6, %c0_7] : memref<32x128xf32, #tpu.memory_space<vmem>>, vector<32x128xf32>
    tpu.vector_store %arg2[%c0_6, %c0_7], %20 {strides = array<i32>} : memref<32x128xf32, #tpu.memory_space<vmem>>, vector<32x128xf32>,
    return
  }
  func.func @transform_0(%arg0: i32) -> (i32, i32) {
    %c0_i32 = arith.constant 0 : i32
    %c0_i32_0 = arith.constant 0 : i32
    return %arg0, %c0_i32 : i32, i32
  }
  func.func @transform_1(%arg0: i32) -> (i32, i32) {
    %c0_i32 = arith.constant 0 : i32
    %c0_i32_0 = arith.constant 0 : i32
    return %arg0, %c0_i32 : i32, i32
  }
}

</mosaic_0001>

<bundles_post_ra>
// kernel: tpu_custom_call.1
= control target key start
LH: loop header
LB: loop body
LE: loop exit
PB: predicated region body
PF: predicated region fallthrough
CT: control target
= control target key end

     0   :  { %6 = vsyncpa [#allocation3], 0  ;;  %s662_s0 = inlined_call_operand.hbm [shape: f32[64,128], index: 0, kind: input, shape index: {}]   ;;  %s663_s1 = inlined_call_operand.hbm [shape: f32[64,128], index: 1, kind: output, shape index: {}]  }
   0x1   :  { %8 = vsyncpa [#allocation3 + $0x1], 0 }
   0x2   :  { %9 = vsyncpa [#allocation4], 0 }
   0x3   :  { %11 = vsyncpa [#allocation4 + $0x1], 0  ;;  %s496_s6 = smov 0   ;;  %s498_s7 = smov 0  }
   0x4   :  { %s500_s8 = smov 0   ;;  %s502_s9 = smov 0  }
   0x5 LB: > { %s517_s10 = sadd.s32 4294967295, %s478_s9   ;;  %s292_s11 = sadd.s32 4294967294, %s478_s9   ;;  %s478_s9 = sphi %s502_s9, %s676_s9   ;;  %s474_s8 = sphi %s500_s8, %s675_s8   ;;  %s470_s7 = sphi %s498_s7, %s674_s7   ;;  %s466_s6 = sphi %s496_s6, %s673_s6  }
   0x6   : > { %s521_s12 = sadd.s32 1, %s478_s9   ;;  %s24_s13 = sadd.s32 1, %s474_s8 }
   0x7   : > { %s21_s14 = ssub.s32 %s478_s9, %s521_s12  ;;  %p31_p0 = scmp.ne.s32.totalorder %s474_s8, %s470_s7 }
   0x8   : > { %p22_p1 = scmp.eq.s32.totalorder %s21_s14, 0  ;;  %p32_p2 = scmp.eq.s32.totalorder %s478_s9, 0 }
   0x9   : > { %p37_p3 = scmp.ne.s32.totalorder %s470_s7, %s466_s6  ;;  %p38_p4 = scmp.eq.s32.totalorder %s517_s10, 0 }
   0xa   : > { %s533_s15 = scalar_select %p22_p1, %s474_s8, %s24_s13  }
   0xb   : > { %p535_p5 = por %p32_p2, %p31_p0  ;;  %p539_p6 = por %p38_p4, %p37_p3 }
   0xc   : > { %p61_p7 = scmp.eq.s32.totalorder %s517_s10, 1  ;;  %p67_p8 = scmp.eq.s32.totalorder %s292_s11, 1 }
   0xd   : > { %p320_p10 = scmp.lt.s32.totalorder %s478_s9, 2  ;;  %s87_s20 = sand.u32 1, %s474_s8  }
   0xe   : > { %p546_p11 = por %p61_p7, %p31_p0  ;;  %p550_p12 = por %p67_p8, %p37_p3 }
   0xf   : > { %s306_s21 = sshll.u32 %s478_s9, 9  ;;  %s295_s22 = sshll.u32 %s87_s20, 5 }
  0x10   : > { %s667_s18 = scalar_select %p546_p11, 1, 0 }
  0x11   : > { %s668_s19 = scalar_select %p550_p12, 1, 0 }
  0x12   : > { %s559_s25 = scalar_lea.hbm %s662_s0, %s306_s21  ;;  %s91_s26 = scalar_lea.vmem [#allocation2], %s295_s22 }
  0x13   : > { %s98_s27 = sshll.u32 %s91_s26, 4  ;;  %p563_p13 = pnand %p320_p10, %p535_p5  ;;  %s567_s27 = int_to_ptr.vmem [resolvable:$true] %s98_s27 }
  0x14   : > { %s569_s29 = scalar_lea.sflag [#allocation3], %s87_s20  ;;  %s382_s30 = scalar_lea.hbm %s559_s25, 512 }
  0x15   : > { %p383_p0 = scmp.ne.s32.totalorder %s559_s25, %s382_s30  ;;  %p384_p1 = pneg %p563_p13 }
  0x16   : > { %s387_s4 = scalar_lea.hbm %s662_s0, 1024  ;;  %p388_p4 = scmp.lt.u32.totalorder %s559_s25, %s662_s0 }
  0x17   : > { %p385_p2 = pnand %p384_p1, %p383_p0  ;;  %p389_p5 = scmp.lt.u32.totalorder %s387_s4, %s382_s30 }
  0x18   : > { %p391_p8 = scmp.lt.u32.totalorder %s382_s30, %s559_s25 }
  0x19   : > { %p386_p3 = pneg %p385_p2  ;;  %p390_p7 = por %p389_p5, %p388_p4 }
  0x1b   : > { %p392_p10 = por %p391_p8, %p390_p7 }
  0x1d   : > { %p393_p9 = pnand %p392_p10, %p386_p3 }
  0x1f   : > { %396 = shalt.err (!%p393_p9)
}
  0x20   : > { %s397_s13 = scalar_lea.vmem %s567_s27, 512  ;;  %s480_s14 = smov [#allocation2]  }
  0x21   : > { %p398_p0 = scmp.ne.s32.totalorder %s567_s27, %s397_s13  ;;  %s402_s16 = sshll.u32 %s480_s14, 4  ;;  %s403_s16 = int_to_ptr.vmem [resolvable:$false] %s402_s16 }
  0x22   : > { %s404_s20 = scalar_lea.vmem %s403_s16, 1024  ;;  %p405_p11 = scmp.lt.s32.totalorder %s567_s27, %s403_s16 }
  0x23   : > { %p400_p2 = pnand %p398_p0, %p384_p1  ;;  %p406_p4 = scmp.lt.s32.totalorder %s404_s20, %s397_s13 }
  0x25   : > { %p401_p12 = pneg %p400_p2  ;;  %p407_p5 = por %p406_p4, %p405_p11 }
  0x27   : > { %p408_p7 = pnand %p407_p5, %p401_p12 }
  0x29   : > { %411 = shalt.err (!%p408_p7)
}
  0x2a   : > { %s481_s21 = smov 128   ;;  %s482_s22 = smov 8  }
  0x2b   : > { %315 = dma.hbm_to_vmem [thread:$0]  (!%p563_p13), %s559_s25, 512, %s567_s27, %s569_s29, %s481_s21, %s481_s21, %s482_s22  }
  0x2c   : > { %p298_p9 = scmp.ge.s32.totalorder %s478_s9, 1  ;;  %p106_p1 = scmp.lt.s32.totalorder %s478_s9, 3 }
  0x2e   : > { %p107_p3 = pnand %p298_p9, %p106_p1 }
  0x2f   : > { %s600_s23 = sand.u32 (!%p107_p3), 1, %s470_s7  }
  0x30   : > { %110 = sbr.rel (%p107_p3) target bundleno = 394 (0x18a), region = 24  ;;  %s299_s24 = sshll.u32 (!%p107_p3), %s600_s23, 5 }
  0x31   : > { %s113_s26 = scalar_lea.sflag (!%p107_p3), [#allocation3], %s600_s23  ;;  %s116_s30 = scalar_lea.vmem (!%p107_p3), [#allocation2], %s299_s24 }
  0x37   : > { %457 = dma.done.wait (%p539_p6), %s113_s26, 512  }
  0x38   : > { %459 = vsyncadd (%p539_p6), %s113_s26, 4294966784  ;;  %v137_v0 = vld [vmem:[%s116_s30] sm:$0xff]  ;;  %v139_v1 = vld [vmem:[%s116_s30 + $0x10] sm:$0xff]  ;;  %s134_s17 = scalar_lea.vmem [#allocation5], %s299_s24  ;;  %s307_s25 = sshll.u32 %s517_s10, 9 }
  0x39   : > { %141 = vmax.xlane.f32.xlu0 %v137_v0  ;;  %145 = vmax.xlane.f32.xlu1 %v139_v1  ;;  %v138_v2 = vld [vmem:[%s116_s30 + $0x8] sm:$0xff]  ;;  %v140_v3 = vld [vmem:[%s116_s30 + $0x18] sm:$0xff]  ;;  %v161_v4 = vmul.f32 0.5, %v137_v0  ;;  %v163_v5 = vmul.f32 0.5, %v139_v1  ;;  %s219_s27 = sshll.u32 %s134_s17, 4  ;;  %s616_s2 = scalar_lea.hbm %s663_s1, %s307_s25  ;;  %s618_s27 = int_to_ptr.vmem [resolvable:$true] %s219_s27 }
  0x3a   : > { %v162_v6 = vmul.f32 0.5, %v138_v2  ;;  %v164_v7 = vmul.f32 0.5, %v140_v3  ;;  %s206_s3 = scalar_lea.sflag [#allocation4], %s600_s23  ;;  %s412_s4 = scalar_lea.vmem %s618_s27, 512 }
  0x3b   : > { %358 = vtanh.f32 %v161_v4  ;;  %p413_p6 = scmp.ne.s32.totalorder %s618_s27, %s412_s4  ;;  %p670_p11 = scmp.ne.s32.totalorder %s667_s18, 0 }
  0x3c   : > { %360 = vtanh.f32 %v163_v5  ;;  %s483_s10 = smov [#allocation5]  }
  0x3d   : > { %143 = vmax.xlane.f32.xlu0 %v138_v2  ;;  %147 = vmax.xlane.f32.xlu1 %v140_v3  ;;  %362 = vtanh.f32 %v162_v6  ;;  %p414_p12 = pnand %p413_p6, %p670_p11  ;;  %s416_s5 = sshll.u32 %s483_s10, 4  ;;  %s417_s5 = int_to_ptr.vmem [resolvable:$false] %s416_s5 }
  0x3e   : > { %364 = vtanh.f32 %v164_v7  ;;  %s418_s11 = scalar_lea.vmem %s417_s5, 1024  ;;  %p419_p8 = scmp.lt.s32.totalorder %s618_s27, %s417_s5 }
  0x3f   : > { %p415_p13 = pneg %p414_p12  ;;  %p420_p10 = scmp.lt.s32.totalorder %s418_s11, %s412_s4 }
  0x41   : > { %p421_p0 = por %p420_p10, %p419_p8 }
  0x43   : > { %p422_p2 = pnand %p421_p0, %p415_p13 }
  0x45   : > { %v359_v10 = vpop.eup %358 }
  0x46   : > { %v361_v13 = vpop.eup %360  ;;  %v169_v18 = vmul.f32 0.5, %v359_v10 }
  0x47   : > { %v363_v19 = vpop.eup %362  ;;  %v171_v22 = vmul.f32 0.5, %v361_v13 }
  0x48   : > { %v365_v23 = vpop.eup %364  ;;  %v173_v26 = vadd.f32 0.5, %v169_v18  ;;  %v170_v27 = vmul.f32 0.5, %v363_v19 }
  0x49   : > { %v175_v28 = vadd.f32 0.5, %v171_v22  ;;  %v172_v29 = vmul.f32 0.5, %v365_v23 }
  0x4a   : > { %v177_v30 = vadd.f32 1e-12, %v173_v26  ;;  %v174_v31 = vadd.f32 0.5, %v170_v27 }
  0x4b   : > { %v179_v32 = vadd.f32 1e-12, %v175_v28  ;;  %v176_v33 = vadd.f32 0.5, %v172_v29 }
  0x4c   : > { %v178_v37 = vadd.f32 1e-12, %v174_v31 }
  0x4d   : > { %v180_v39 = vadd.f32 1e-12, %v176_v33 }
  0xc6   : > { %v142_v8 = vpop.xlane.xlu0 %141  ;;  %v146_v9 = vpop.xlane.xlu1 %145 }
  0xc7   : > { %v149_v11 = vsub.f32 %v137_v0, %v142_v8  ;;  %v151_v12 = vsub.f32 %v139_v1, %v146_v9 }
  0xc9   : > { %v153_v14 = vmul.f32 1.442695, %v149_v11  ;;  %v157_v15 = vmul.f32 1.442695, %v151_v12 }
  0xca   : > { %v144_v16 = vpop.xlane.xlu0 %143  ;;  %v148_v17 = vpop.xlane.xlu1 %147 }
  0xcb   : > { %366 = vpow2.f32 %v153_v14  ;;  %v150_v20 = vsub.f32 %v138_v2, %v144_v16  ;;  %v152_v21 = vsub.f32 %v140_v3, %v148_v17 }
  0xcc   : > { %368 = vpow2.f32 %v157_v15 }
  0xcd   : > { %v155_v24 = vmul.f32 1.442695, %v150_v20  ;;  %v159_v25 = vmul.f32 1.442695, %v152_v21 }
  0xcf   : > { %370 = vpow2.f32 %v155_v24 }
  0xd0   : > { %372 = vpow2.f32 %v159_v25 }
  0xd5   : > { %v367_v34 = vpop.eup %366 }
  0xd6   : > { %v369_v35 = vpop.eup %368  ;;  %v181_v36 = vmul.f32 %v367_v34, %v177_v30 }
  0xd7   : > { %v183_v38 = vmul.f32 %v369_v35, %v179_v32 }
  0xd8   : > { %185 = vadd.xlane.f32.xlu0 %v181_v36 }
  0xd9   : > { %v371_v40 = vpop.eup %370 }
  0xda   : > { %v373_v41 = vpop.eup %372  ;;  %v182_v42 = vmul.f32 %v371_v40, %v178_v37 }
  0xdb   : > { %v184_v43 = vmul.f32 %v373_v41, %v180_v39 }
  0xdc   : > { %187 = vadd.xlane.f32.xlu1 %v182_v42  ;;  %189 = vadd.xlane.f32.xlu0 %v183_v38 }
  0xe0   : > { %191 = vadd.xlane.f32.xlu1 %v184_v43 }
 0x165   : > { %v186_v44 = vpop.xlane.xlu0 %185 }
 0x166   : > { %374 = vrcp.f32 %v186_v44 }
 0x169   : > { %v188_v45 = vpop.xlane.xlu1 %187  ;;  %v190_v46 = vpop.xlane.xlu0 %189 }
 0x16a   : > { %376 = vrcp.f32 %v188_v45 }
 0x16b   : > { %378 = vrcp.f32 %v190_v46 }
 0x16d   : > { %v192_v47 = vpop.xlane.xlu1 %191 }
 0x16e   : > { %380 = vrcp.f32 %v192_v47 }
 0x170   : > { %v375_v48 = vpop.eup %374 }
 0x171   : > { %v197_v49 = vmul.f32 %v375_v48, %v181_v36 }
 0x173   : > { %201 = vst [vmem:[%s134_s17] sm:$0xff] %v197_v49 }
 0x174   : > { %v377_v50 = vpop.eup %376 }
 0x175   : > { %v379_v51 = vpop.eup %378  ;;  %v198_v52 = vmul.f32 %v377_v50, %v182_v42 }
 0x176   : > { %v199_v53 = vmul.f32 %v379_v51, %v183_v38 }
 0x177   : > { %202 = vst [vmem:[%s134_s17 + $0x8] sm:$0xff] %v198_v52 }
 0x178   : > { %v381_v54 = vpop.eup %380  ;;  %203 = vst [vmem:[%s134_s17 + $0x10] sm:$0xff] %v199_v53 }
 0x179   : > { %v200_v55 = vmul.f32 %v381_v54, %v184_v43 }
 0x17b   : > { %204 = vst [vmem:[%s134_s17 + $0x18] sm:$0xff] %v200_v55 }
 0x17c   : > { %425 = shalt.err (!%p422_p2)
}
 0x17d   : > { %s426_s13 = scalar_lea.hbm %s616_s2, 512  ;;  %s430_s20 = scalar_lea.hbm %s663_s1, 1024 }
 0x17e   : > { %p427_p4 = scmp.ne.s32.totalorder %s616_s2, %s426_s13  ;;  %p431_p9 = scmp.lt.u32.totalorder %s616_s2, %s663_s1 }
 0x17f   : > { %p432_p1 = scmp.lt.u32.totalorder %s430_s20, %s426_s13  ;;  %p434_p6 = scmp.lt.u32.totalorder %s426_s13, %s616_s2 }
 0x180   : > { %p428_p5 = pnand %p427_p4, %p670_p11 }
 0x181   : > { %p433_p3 = por %p432_p1, %p431_p9 }
 0x182   : > { %p429_p7 = pneg %p428_p5 }
 0x183   : > { %p435_p12 = por %p434_p6, %p433_p3 }
 0x185   : > { %p436_p13 = pnand %p435_p12, %p429_p7 }
 0x187   : > { %439 = shalt.err (!%p436_p13)
}
 0x188   : > { %s484_s24 = smov 128   ;;  %s485_s26 = smov 8  }
 0x189   : > { %310 = dma.vmem_to_hbm [thread:$0]  (%p670_p11), %s618_s27, 512, %s616_s2, %s206_s3, %s484_s24, %s484_s24, %s485_s26  }
 0x18a PF: > { %s234_s30 = sand.u32 1, %s466_s6   ;;  %p671_p8 = scmp.ne.s32.totalorder %s668_s19, 0 }
 0x18b   : > { %p672_p10 = scmp.ge.s32.totalorder %s478_s9, 2  ;;  %s235_s17 = scalar_lea.sflag [#allocation4], %s234_s30 }
 0x18d   : > { %p317_p0 = pnand %p672_p10, %p671_p8 }
 0x18f   : > { %461 = dma.done.wait (!%p317_p0), %s235_s17, 512  }
 0x190   : > { %463 = vsyncadd (!%p317_p0), %s235_s17, 4294966784  ;;  %p14_p2 = scmp.ge.s32.totalorder %s521_s12, 4   ;;  %s673_s6 = smov %s470_s7 }
 0x191   : > { %s674_s7 = smov %s474_s8  ;;  %s675_s8 = smov %s533_s15 }
 0x192   : > { %s676_s9 = smov %s521_s12  ;;  %16 = sbr.rel (!%p14_p2) target bundleno = 5 (0x5), region = 69 }
 0x199   :  { %240 = vsyncpa [#allocation3], 1 }
 0x19a   :  { %242 = vsyncpa [#allocation3 + $0x1], 1 }
 0x19b   :  { %243 = vsyncpa [#allocation4], 1 }
 0x19c   :  { %245 = vsyncpa [#allocation4 + $0x1], 1 }

</bundles_post_ra>
